<compile_context>
chip_gen: v7x
topology: tpu7x:2x2x1
jax: 0.10.0
libtpu: 0.0.40
codegen_flags: <defaults>
</compile_context>

<pallas_src>
import jax
import jax.numpy as jnp
from jax.experimental import pallas as pl
from jax.experimental.pallas import tpu as pltpu

_MXU_ALIGN = 128            # lane width: N/K dims of the weights, lane-dense output
_SINGLE_BUFFER_WEIGHT_BYTES = 4 << 20   # only bother with Buffered(1) above this


# --------------------------------------------------------------------------- #
# Kernel
# --------------------------------------------------------------------------- #
def ff_kernel(x_ref, w1_ref, b1_ref, w2_ref, b2_ref, w3_ref, b3_ref, o_ref):
    f32 = jnp.float32
    # Cast x to the MXU operand dtype here (in VMEM) instead of materializing a
    # padded/cast copy in HBM.  K = in_dim is unpadded; Mosaic handles it.
    x = x_ref[...].astype(w1_ref.dtype)
    # layer 1: f32 accumulation on the MXU, bias add + tanh in f32 (v5e-safe).
    h1 = jnp.tanh(
        jnp.dot(x, w1_ref[...], preferred_element_type=f32) + b1_ref[...]
    )
    h1 = h1.astype(w2_ref.dtype)           # feed MXU with the weight dtype
    h2 = jnp.tanh(
        jnp.dot(h1, w2_ref[...], preferred_element_type=f32) + b2_ref[...]
    )
    h2 = h2.astype(w3_ref.dtype)
    out = jnp.tanh(
        jnp.dot(h2, w3_ref[...], preferred_element_type=f32) + b3_ref[...]
    )
    o_ref[...] = out.astype(o_ref.dtype)


# --------------------------------------------------------------------------- #
# Helpers
# --------------------------------------------------------------------------- #
def _round_up(n, m):
    return ((n + m - 1) // m) * m


def _pick_block_batch(B, sublane):
    # Small batches: one grid step.  v5e/v6e have a single TensorCore, so the
    # grid is a serial loop; splitting tiny batches only adds per-step overhead.
    if B <= 512:
        return max(_round_up(B, sublane), sublane)
    # Large batches: 512-row tiles amortize the ~0.35us/step fixed cost and get
    # close to the HBM roofline; grid >= 2 gives each v7x TC >= 256 rows.
    return 512


def _supports_pipeline_mode():
    if not hasattr(pl, "Buffered"):
        return False
    try:
        pl.BlockSpec((8, 128), lambda i: (0, 0), pipeline_mode=pl.Buffered(1))
        return True
    except TypeError:
        return False


_PIPELINE_MODE_OK = _supports_pipeline_mode()

_FALLBACK_ERRORS = (TypeError, NotImplementedError)
if hasattr(pltpu, "LoweringException"):
    _FALLBACK_ERRORS = _FALLBACK_ERRORS + (pltpu.LoweringException,)


def _vmem_capacity_bytes():
    try:
        cap = getattr(pltpu.get_tpu_info(), "vmem_capacity_bytes", None)
        if cap:
            return int(cap)
    except Exception:
        pass
    return 64 << 20   # conservative default: v7x per-TC VMEM


# --------------------------------------------------------------------------- #
# pallas_call builder
# --------------------------------------------------------------------------- #
def _build_ff_call(bm, B_p, in_dim, h_p, out_p, mxu_dtype, single_buffer_weights):
    grid = (B_p // bm,)
    wbytes = jnp.dtype(mxu_dtype).itemsize

    def const_spec(shape):
        if single_buffer_weights:
            # Grid-invariant operand: keep one resident copy (no double buffer).
            return pl.BlockSpec(shape, lambda i: (0, 0),
                                pipeline_mode=pl.Buffered(1))
        return pl.BlockSpec(shape, lambda i: (0, 0))

    in_specs = [
        # x tile moves each step; last dim == full in_dim (unpadded) is legal.
        pl.BlockSpec((bm, in_dim), lambda i: (i, 0)),
        const_spec((in_dim, h_p)),   # w1 (K unpadded, N lane-aligned)
        const_spec((1, h_p)),        # b1 (f32)
        const_spec((h_p, h_p)),      # w2
        const_spec((1, h_p)),        # b2
        const_spec((h_p, out_p)),    # w3
        const_spec((1, out_p)),      # b3
    ]
    out_specs = pl.BlockSpec((bm, out_p), lambda i: (i, 0))

    # VMEM budget from the actual tile footprint, clamped to device capacity.
    w_buf = 1 if single_buffer_weights else 2
    weight_bytes = (in_dim * h_p + h_p * h_p + h_p * out_p) * wbytes
    vmem_bytes = (
        2 * bm * in_dim * 4                      # x tile (f32, double-buffered)
        + w_buf * weight_bytes                   # weights
        + w_buf * (2 * h_p + out_p) * 4          # biases (f32)
        + 2 * bm * out_p * 4                     # out tile (f32, double-buffered)
        + 2 * bm * h_p * 4                       # h1/h2 intermediates
    )
    # TODO(synk): K/N-tile the contraction (extra "arbitrary" grid axis + f32
    # VMEM accumulator) if w_buf*weight_bytes ever approaches per-TC VMEM
    # (relevant on v7x for hidden sizes in the thousands).
    capacity = _vmem_capacity_bytes()
    vmem_limit = max(int(1.25 * vmem_bytes) + (4 << 20), 16 << 20)
    vmem_limit = min(vmem_limit, int(0.75 * capacity))

    flops = 2 * B_p * (in_dim * h_p + h_p * h_p + h_p * out_p)
    transcendentals = B_p * (2 * h_p + out_p)
    bytes_accessed = (
        B_p * in_dim * 4 + weight_bytes + (2 * h_p + out_p) * 4 + B_p * out_p * 4
    )

    return pl.pallas_call(
        ff_kernel,
        out_shape=jax.ShapeDtypeStruct((B_p, out_p), jnp.float32),
        grid=grid,
        in_specs=in_specs,
        out_specs=out_specs,
        compiler_params=pltpu.CompilerParams(
            dimension_semantics=("parallel",),
            vmem_limit_bytes=vmem_limit,
        ),
        cost_estimate=pl.CostEstimate(
            flops=int(flops),
            transcendentals=int(transcendentals),
            bytes_accessed=int(bytes_accessed),
        ),
    )


# --------------------------------------------------------------------------- #
# Params: pad / cast ONCE (grid-invariant tensors)
# --------------------------------------------------------------------------- #
def prepare_params(params, *, use_bf16_matmul=True):
    """Pad (lane-align N/K of the hidden dims) and cast the weights once.

    Zero padding is exactly neutral: tanh(0)=0 and zero rows/cols add nothing.
    The first-layer K dim (in_dim) is left unpadded so x can be streamed as-is.
    """
    w1, b1 = params["w1"], params["b1"]
    w2, b2 = params["w2"], params["b2"]
    w3, b3 = params["w3"], params["b3"]
    in_dim, hidden = w1.shape
    out_dim = w3.shape[1]
    h_p = _round_up(hidden, _MXU_ALIGN)
    out_p = _round_up(out_dim, _MXU_ALIGN)
    mxu_dtype = jnp.bfloat16 if use_bf16_matmul else jnp.float32

    def pad2(a, rows, cols, dtype):
        r, c = a.shape
        return jnp.pad(a, ((0, rows - r), (0, cols - c))).astype(dtype)

    return dict(
        w1=pad2(w1, in_dim, h_p, mxu_dtype),
        b1=pad2(b1, 1, h_p, jnp.float32),
        w2=pad2(w2, h_p, h_p, mxu_dtype),
        b2=pad2(b2, 1, h_p, jnp.float32),
        w3=pad2(w3, h_p, out_p, mxu_dtype),
        b3=pad2(b3, 1, out_p, jnp.float32),
        in_dim=in_dim, hidden=hidden, out_dim=out_dim,
        h_p=h_p, out_p=out_p,
        mxu_dtype=mxu_dtype, use_bf16_matmul=use_bf16_matmul,
    )


# --------------------------------------------------------------------------- #
# Forward
# --------------------------------------------------------------------------- #
def ff_forward(x, prep, *, block_batch=None):
    """Fused 3-layer tanh MLP.  x: (B, input_dim) float32, prep: prepare_params()."""
    B, in_dim = x.shape
    assert in_dim == prep["in_dim"], "input feature dim mismatch"
    h_p, out_p = prep["h_p"], prep["out_p"]
    mxu_dtype = prep["mxu_dtype"]
    sublane = 16 if prep["use_bf16_matmul"] else 8

    bm = block_batch if block_batch is not None else _pick_block_batch(B, sublane)
    bm = max(_round_up(bm, sublane), sublane)
    B_p = _round_up(B, bm)

    # Only the batch rows are padded (cheap: in_dim-wide); feature dims of x are
    # NOT padded in HBM any more.
    x_p = x.astype(jnp.float32)
    if B_p != B:
        x_p = jnp.pad(x_p, ((0, B_p - B), (0, 0)))

    args = (x_p, prep["w1"], prep["b1"], prep["w2"], prep["b2"],
            prep["w3"], prep["b3"])

    wbytes = jnp.dtype(mxu_dtype).itemsize
    weight_bytes = (in_dim * h_p + h_p * h_p + h_p * out_p) * wbytes
    single_buf = _PIPELINE_MODE_OK and weight_bytes > _SINGLE_BUFFER_WEIGHT_BYTES

    if single_buf:
        try:
            call = _build_ff_call(bm, B_p, in_dim, h_p, out_p, mxu_dtype,
                                  single_buffer_weights=True)
            out_padded = call(*args)
        except _FALLBACK_ERRORS:
            # Narrow fallback: pipeline_mode unsupported on this jax version.
            call = _build_ff_call(bm, B_p, in_dim, h_p, out_p, mxu_dtype,
                                  single_buffer_weights=False)
            out_padded = call(*args)
    else:
        call = _build_ff_call(bm, B_p, in_dim, h_p, out_p, mxu_dtype,
                              single_buffer_weights=False)
        out_padded = call(*args)

    # Consumers that tolerate the padded (B_p, out_p) slab can skip this slice.
    return out_padded[:B, :prep["out_dim"]]


# --------------------------------------------------------------------------- #
# Params init / pure-JAX reference
# --------------------------------------------------------------------------- #
def init_params(key, input_dim, hidden_dim, output_dim, dtype=jnp.float32):
    """torch.nn.Linear-style init: U(-1/sqrt(fan_in), 1/sqrt(fan_in))."""
    ks = jax.random.split(key, 6)

    def linear(kw, kb, fan_in, fan_out):
        bound = 1.0 / jnp.sqrt(fan_in)
        w = jax.random.uniform(kw, (fan_in, fan_out), dtype, -bound, bound)
        b = jax.random.uniform(kb, (1, fan_out), dtype, -bound, bound)
        return w, b

    w1, b1 = linear(ks[0], ks[1], input_dim, hidden_dim)
    w2, b2 = linear(ks[2], ks[3], hidden_dim, hidden_dim)
    w3, b3 = linear(ks[4], ks[5], hidden_dim, output_dim)
    return dict(w1=w1, b1=b1, w2=w2, b2=b2, w3=w3, b3=b3)


def ff_reference(x, p):
    h1 = jnp.tanh(x @ p["w1"] + p["b1"])
    h2 = jnp.tanh(h1 @ p["w2"] + p["b2"])
    return jnp.tanh(h2 @ p["w3"] + p["b3"])


# --------------------------------------------------------------------------- #
# Self-test
# --------------------------------------------------------------------------- #
if __name__ == "__main__":
    # Small mujoco-ish shapes: obs dim=16, hidden=32, action dim=8.
    B, input_dim, hidden_dim, output_dim = 64, 16, 32, 8

    key = jax.random.PRNGKey(0)
    kx, kp = jax.random.split(key)
    x = jax.random.normal(kx, (B, input_dim), dtype=jnp.float32)
    params = init_params(kp, input_dim, hidden_dim, output_dim)

    ref = ff_reference(x, params)

    # 1) Pure-f32 path (single grid step for this small batch): tight tolerance.
    prep_f32 = prepare_params(params, use_bf16_matmul=False)
    out_f32 = jax.block_until_ready(ff_forward(x, prep_f32))
    assert out_f32.shape == (B, output_dim)
    assert jnp.allclose(out_f32, ref, atol=1e-4, rtol=1e-4)

    # 2) Default bf16-operand / f32-accumulate path: loose tolerance
    #    (intermediates are cast to bf16 between layers -- documented accuracy
    #    contract; pure-f32 path above is the tight one).
    prep_bf16 = prepare_params(params, use_bf16_matmul=True)
    out_bf16 = jax.block_until_ready(ff_forward(x, prep_bf16))
    assert out_bf16.shape == (B, output_dim)
    assert jnp.allclose(out_bf16, ref, atol=5e-2, rtol=5e-2)

    # 3) Ragged batch (B not a multiple of the sublane pack): row-padding path.
    out_r = jax.block_until_ready(ff_forward(x[:50], prep_f32))
    assert out_r.shape == (50, output_dim)
    assert jnp.allclose(out_r, ref[:50], atol=1e-4, rtol=1e-4)

    # 4) Forced multi-step grid (exercise x/out pipelining across 4 steps).
    out_g = jax.block_until_ready(ff_forward(x, prep_f32, block_batch=16))
    assert out_g.shape == (B, output_dim)
    assert jnp.allclose(out_g, ref, atol=1e-4, rtol=1e-4)

    print("KERNEL_OK")
</pallas_src>

<mosaic_0001>
module attributes {stable_mosaic.version = 11 : i64} {
  func.func @ff_kernel(%arg0: i32, %arg1: memref<64x16xf32, #tpu.memory_space<vmem>>, %arg2: memref<16x128xf32, #tpu.memory_space<vmem>>, %arg3: memref<1x128xf32, #tpu.memory_space<vmem>>, %arg4: memref<128x128xf32, #tpu.memory_space<vmem>>, %arg5: memref<1x128xf32, #tpu.memory_space<vmem>>, %arg6: memref<128x128xf32, #tpu.memory_space<vmem>>, %arg7: memref<1x128xf32, #tpu.memory_space<vmem>>, %arg8: memref<64x128xf32, #tpu.memory_space<vmem>>) attributes {dimension_semantics = [#tpu.dimension_semantics<parallel>], iteration_bounds = array<i64: 1>, scalar_prefetch = 0 : i64, scratch_operands = 0 : i64, tpu.core_type = #tpu.core_type<tc>, window_params = [{transform_indices = @transform_0, window_bounds = array<i64: 64, 16>}, {pipeline_mode = #tpu.pipeline_mode<synchronous>, transform_indices = @transform_1, window_bounds = array<i64: 16, 128>}, {pipeline_mode = #tpu.pipeline_mode<synchronous>, transform_indices = @transform_2, window_bounds = array<i64: 1, 128>}, {pipeline_mode = #tpu.pipeline_mode<synchronous>, transform_indices = @transform_3, window_bounds = array<i64: 128, 128>}, {pipeline_mode = #tpu.pipeline_mode<synchronous>, transform_indices = @transform_4, window_bounds = array<i64: 1, 128>}, {pipeline_mode = #tpu.pipeline_mode<synchronous>, transform_indices = @transform_5, window_bounds = array<i64: 128, 128>}, {pipeline_mode = #tpu.pipeline_mode<synchronous>, transform_indices = @transform_6, window_bounds = array<i64: 1, 128>}, {transform_indices = @transform_7, window_bounds = array<i64: 64, 128>}]} {
    %c0 = arith.constant 0 : index
    %c0_0 = arith.constant 0 : index
    %0 = vector.load %arg1[%c0, %c0_0] : memref<64x16xf32, #tpu.memory_space<vmem>>, vector<64x16xf32>
    %c0_1 = arith.constant 0 : index
    %c0_2 = arith.constant 0 : index
    %1 = vector.load %arg2[%c0_1, %c0_2] : memref<16x128xf32, #tpu.memory_space<vmem>>, vector<16x128xf32>
    %cst = arith.constant dense<0.000000e+00> : vector<64x128xf32>
    %2 = tpu.matmul %0, %1, %cst {dimension_numbers = #tpu.dot_dimension_numbers<[1], [0], [0], [1], [0, 0, 1, 1], [], []>} : vector<64x16xf32>, vector<16x128xf32>, vector<64x128xf32> -> vector<64x128xf32>
    %c0_3 = arith.constant 0 : index
    %c0_4 = arith.constant 0 : index
    %3 = vector.load %arg3[%c0_3, %c0_4] : memref<1x128xf32, #tpu.memory_space<vmem>>, vector<1x128xf32>
    %4 = vector.broadcast %3 : vector<1x128xf32> to vector<64x128xf32>
    %5 = arith.addf %2, %4 : vector<64x128xf32>
    %6 = math.tanh %5 : vector<64x128xf32>
    %c0_5 = arith.constant 0 : index
    %c0_6 = arith.constant 0 : index
    %7 = vector.load %arg4[%c0_5, %c0_6] : memref<128x128xf32, #tpu.memory_space<vmem>>, vector<128x128xf32>
    %cst_7 = arith.constant dense<0.000000e+00> : vector<64x128xf32>
    %8 = tpu.matmul %6, %7, %cst_7 {dimension_numbers = #tpu.dot_dimension_numbers<[1], [0], [0], [1], [0, 0, 1, 1], [], []>} : vector<64x128xf32>, vector<128x128xf32>, vector<64x128xf32> -> vector<64x128xf32>
    %c0_8 = arith.constant 0 : index
    %c0_9 = arith.constant 0 : index
    %9 = vector.load %arg5[%c0_8, %c0_9] : memref<1x128xf32, #tpu.memory_space<vmem>>, vector<1x128xf32>
    %10 = vector.broadcast %9 : vector<1x128xf32> to vector<64x128xf32>
    %11 = arith.addf %8, %10 : vector<64x128xf32>
    %12 = math.tanh %11 : vector<64x128xf32>
    %c0_10 = arith.constant 0 : index
    %c0_11 = arith.constant 0 : index
    %13 = vector.load %arg6[%c0_10, %c0_11] : memref<128x128xf32, #tpu.memory_space<vmem>>, vector<128x128xf32>
    %cst_12 = arith.constant dense<0.000000e+00> : vector<64x128xf32>
    %14 = tpu.matmul %12, %13, %cst_12 {dimension_numbers = #tpu.dot_dimension_numbers<[1], [0], [0], [1], [0, 0, 1, 1], [], []>} : vector<64x128xf32>, vector<128x128xf32>, vector<64x128xf32> -> vector<64x128xf32>
    %c0_13 = arith.constant 0 : index
    %c0_14 = arith.constant 0 : index
    %15 = vector.load %arg7[%c0_13, %c0_14] : memref<1x128xf32, #tpu.memory_space<vmem>>, vector<1x128xf32>
    %16 = vector.broadcast %15 : vector<1x128xf32> to vector<64x128xf32>
    %17 = arith.addf %14, %16 : vector<64x128xf32>
    %18 = math.tanh %17 : vector<64x128xf32>
    %c0_15 = arith.constant 0 : index
    %c0_16 = arith.constant 0 : index
    %19 = vector.load %arg8[%c0_15, %c0_16] : memref<64x128xf32, #tpu.memory_space<vmem>>, vector<64x128xf32>
    tpu.vector_store %arg8[%c0_15, %c0_16], %18 {strides = array<i32>} : memref<64x128xf32, #tpu.memory_space<vmem>>, vector<64x128xf32>,
    return
  }
  func.func @transform_0(%arg0: i32) -> (i32, i32) {
    %c0_i32 = arith.constant 0 : i32
    %c0_i32_0 = arith.constant 0 : i32
    return %arg0, %c0_i32 : i32, i32
  }
  func.func @transform_1(%arg0: i32) -> (i32, i32) {
    %c0_i32 = arith.constant 0 : i32
    %c0_i32_0 = arith.constant 0 : i32
    %c0_i32_1 = arith.constant 0 : i32
    return %c0_i32, %c0_i32_0 : i32, i32
  }
  func.func @transform_2(%arg0: i32) -> (i32, i32) {
    %c0_i32 = arith.constant 0 : i32
    %c0_i32_0 = arith.constant 0 : i32
    %c0_i32_1 = arith.constant 0 : i32
    return %c0_i32, %c0_i32_0 : i32, i32
  }
  func.func @transform_3(%arg0: i32) -> (i32, i32) {
    %c0_i32 = arith.constant 0 : i32
    %c0_i32_0 = arith.constant 0 : i32
    %c0_i32_1 = arith.constant 0 : i32
    return %c0_i32, %c0_i32_0 : i32, i32
  }
  func.func @transform_4(%arg0: i32) -> (i32, i32) {
    %c0_i32 = arith.constant 0 : i32
    %c0_i32_0 = arith.constant 0 : i32
    %c0_i32_1 = arith.constant 0 : i32
    return %c0_i32, %c0_i32_0 : i32, i32
  }
  func.func @transform_5(%arg0: i32) -> (i32, i32) {
    %c0_i32 = arith.constant 0 : i32
    %c0_i32_0 = arith.constant 0 : i32
    %c0_i32_1 = arith.constant 0 : i32
    return %c0_i32, %c0_i32_0 : i32, i32
  }
  func.func @transform_6(%arg0: i32) -> (i32, i32) {
    %c0_i32 = arith.constant 0 : i32
    %c0_i32_0 = arith.constant 0 : i32
    %c0_i32_1 = arith.constant 0 : i32
    return %c0_i32, %c0_i32_0 : i32, i32
  }
  func.func @transform_7(%arg0: i32) -> (i32, i32) {
    %c0_i32 = arith.constant 0 : i32
    %c0_i32_0 = arith.constant 0 : i32
    return %arg0, %c0_i32 : i32, i32
  }
}

</mosaic_0001>

<bundles_post_ra>
// kernel: tpu_custom_call.1
= control target key start
LH: loop header
LB: loop body
LE: loop exit
PB: predicated region body
PF: predicated region fallthrough
CT: control target
= control target key end

     0   :  { %12 = vsyncpa [#allocation3], 0  ;;  %s1011_s0 = inlined_call_operand.vmem [shape: f32[64,16], index: 0, kind: input, shape index: {}]   ;;  %s1012_s1 = inlined_call_operand.vmem [shape: f32[16,128], index: 1, kind: input, shape index: {}]   ;;  %s1013_s2 = inlined_call_operand.vmem [shape: f32[1,128], index: 2, kind: input, shape index: {}]   ;;  %s1014_s3 = inlined_call_operand.hbm [shape: f32[128,128], index: 3, kind: input, shape index: {}]   ;;  %s1015_s4 = inlined_call_operand.vmem [shape: f32[1,128], index: 4, kind: input, shape index: {}]   ;;  %s1016_s5 = inlined_call_operand.hbm [shape: f32[128,128], index: 5, kind: input, shape index: {}]   ;;  %s1017_s6 = inlined_call_operand.vmem [shape: f32[1,128], index: 6, kind: input, shape index: {}]   ;;  %s1018_s7 = inlined_call_operand.hbm [shape: f32[64,128], index: 7, kind: output, shape index: {}]  }
   0x1   :  { %13 = vsyncpa [#allocation6], 0 }
   0x2   :  { %14 = vsyncpa [#allocation4], 0  ;;  %s874_s24 = smov [#allocation2]   ;;  %s802_s28 = scalar_lea.hbm %s1014_s3, 2048 }
   0x3   :  { %s26_s25 = sshll.u32 %s874_s24, 4  ;;  %p803_p0 = scmp.ne.s32.totalorder %s1014_s3, %s802_s28  ;;  %s27_s25 = int_to_ptr.vmem [resolvable:$true] %s26_s25 }
   0x4   :  { %p806_p1 = scmp.lt.u32.totalorder %s802_s28, %s1014_s3 }
   0x6   :  { %p808_p2 = pnand %p806_p1, %p803_p0 }
   0x8   :  { %811 = shalt.err (!%p808_p2)
}
   0x9   :  { %s812_s10 = scalar_lea.vmem %s27_s25, 2048  ;;  %p817_p4 = scmp.lt.s32.totalorder %s27_s25, %s27_s25 }
   0xa   :  { %p813_p3 = scmp.ne.s32.totalorder %s27_s25, %s812_s10  ;;  %p818_p5 = scmp.lt.s32.totalorder %s812_s10, %s812_s10 }
   0xc   :  { %p819_p6 = por %p818_p5, %p817_p4 }
   0xe   :  { %p820_p7 = pnand %p819_p6, %p813_p3 }
  0x10   :  { %823 = shalt.err (!%p820_p7)
}
  0x11   :  { %s875_s11 = smov 128   ;;  %s876_s12 = smov 8  }
  0x12   :  { %32 = dma.hbm_to_vmem [thread:$0]  %s1014_s3, 2048, %s27_s25, [#allocation3], %s875_s11, %s875_s11, %s876_s12  }
  0x13   :  { %s877_s15 = smov [#allocation5]   ;;  %s824_s19 = scalar_lea.hbm %s1016_s5, 2048 }
  0x14   :  { %s40_s16 = sshll.u32 %s877_s15, 4  ;;  %p825_p8 = scmp.ne.s32.totalorder %s1016_s5, %s824_s19  ;;  %s41_s16 = int_to_ptr.vmem [resolvable:$true] %s40_s16 }
  0x15   :  { %p828_p9 = scmp.lt.u32.totalorder %s824_s19, %s1016_s5 }
  0x17   :  { %p830_p10 = pnand %p828_p9, %p825_p8 }
  0x19   :  { %833 = shalt.err (!%p830_p10)
}
  0x1a   :  { %s834_s24 = scalar_lea.vmem %s41_s16, 2048  ;;  %p839_p12 = scmp.lt.s32.totalorder %s41_s16, %s41_s16 }
  0x1b   :  { %p835_p11 = scmp.ne.s32.totalorder %s41_s16, %s834_s24  ;;  %p840_p13 = scmp.lt.s32.totalorder %s834_s24, %s834_s24 }
  0x1d   :  { %p841_p0 = por %p840_p13, %p839_p12 }
  0x1f   :  { %p842_p1 = pnand %p841_p0, %p835_p11 }
  0x21   :  { %845 = shalt.err (!%p842_p1)
}
  0x22   :  { %46 = dma.hbm_to_vmem [thread:$0]  %s1016_s5, 2048, %s41_s16, [#allocation6], %s875_s11, %s875_s11, %s876_s12  }
  0x23   :  { %868 = dma.done.wait [#allocation3], 2048  }
  0x24   :  { %869 = vsyncadd [#allocation3], 4294965248 }
  0x25   :  { %870 = dma.done.wait [#allocation6], 2048  }
  0x26   :  { %871 = vsyncadd [#allocation6], 4294965248  ;;  %vm72_vm0 = vcmask 130048   ;;  %v63_v0 = vld [vmem:[%s1012_s1] sm:$0xff]  ;;  %v64_v1 = vld [vmem:[%s1012_s1 + $0x8] sm:$0xff] }
  0x27   :  { %v55_v2 = vld [vmem:[%s1011_s0] sm:$0xff]  ;;  %v681_v3 = vpack.c.bf16 %v64_v1, %v63_v0  ;;  %v211_v5 = vld [vmem:[#allocation2 + $0x8] sm:$0xff]  ;;  %v212_v8 = vld [vmem:[#allocation2 + $0x10] sm:$0xff] }
  0x28   :  { %581 = vmatprep.mubr.msk.f32.mxu0 %vm72_vm0, %v55_v2  ;;  %v210_v4 = vld [vmem:[#allocation2] sm:$0xff]  ;;  %v56_v6 = vld [vmem:[%s1011_s0 + $0x8] sm:$0xff]  ;;  %v213_v9 = vld [vmem:[#allocation2 + $0x18] sm:$0xff] }
  0x29   :  { %682 = vmatprep.subr.bf16.mxu0 %v681_v3  ;;  %v685_v7 = vpack.c.bf16 %v211_v5, %v210_v4  ;;  %v57_v10 = vld [vmem:[%s1011_s0 + $0x10] sm:$0xff]  ;;  %v689_v11 = vpack.c.bf16 %v213_v9, %v212_v8  ;;  %v214_v12 = vld [vmem:[#allocation2 + $0x20] sm:$0xff]  ;;  %v215_v13 = vld [vmem:[#allocation2 + $0x28] sm:$0xff] }
  0x2a   :  { %684 = vmatpush3.bf16.msra.mxu0 %v681_v3  ;;  %v58_v14 = vld [vmem:[%s1011_s0 + $0x18] sm:$0xff]  ;;  %v693_v15 = vpack.c.bf16 %v215_v13, %v214_v12  ;;  %v59_v16 = vld [vmem:[%s1011_s0 + $0x20] sm:$0xff]  ;;  %v216_v17 = vld [vmem:[#allocation2 + $0x30] sm:$0xff] }
  0x2b   :  { %686 = vmatprep.subr.bf16.mxu1 %v685_v7  ;;  %v217_v18 = vld [vmem:[#allocation2 + $0x38] sm:$0xff]  ;;  %v60_v19 = vld [vmem:[%s1011_s0 + $0x28] sm:$0xff]  ;;  %v61_v21 = vld [vmem:[%s1011_s0 + $0x30] sm:$0xff] }
  0x2c   :  { %688 = vmatpush3.bf16.msra.mxu1 %v685_v7  ;;  %v697_v20 = vpack.c.bf16 %v217_v18, %v216_v17  ;;  %v62_v22 = vld [vmem:[%s1011_s0 + $0x38] sm:$0xff]  ;;  %v218_v23 = vld [vmem:[#allocation2 + $0x40] sm:$0xff]  ;;  %v219_v24 = vld [vmem:[#allocation2 + $0x48] sm:$0xff] }
  0x2d   :  { %582 = vmatmul.mubr.msk.f32.vlgmr.msra.gmra.mrb[0].mxu0 %vm72_vm0, %v56_v6  ;;  %690 = vmatprep.subr.bf16.mxu1 %v689_v11  ;;  %v701_v25 = vpack.c.bf16 %v219_v24, %v218_v23  ;;  %v220_v26 = vld [vmem:[#allocation2 + $0x50] sm:$0xff]  ;;  %v221_v27 = vld [vmem:[#allocation2 + $0x58] sm:$0xff]  ;;  %v222_v29 = vld [vmem:[#allocation2 + $0x60] sm:$0xff] }
  0x2e   :  { %584 = vmatprep.mubr.msk.f32.mxu0 %vm72_vm0, %v57_v10  ;;  %v705_v28 = vpack.c.bf16 %v221_v27, %v220_v26  ;;  %v223_v30 = vld [vmem:[#allocation2 + $0x68] sm:$0xff]  ;;  %v224_v32 = vld [vmem:[#allocation2 + $0x70] sm:$0xff]  ;;  %v225_v33 = vld [vmem:[#allocation2 + $0x78] sm:$0xff] }
  0x2f   :  { %v709_v31 = vpack.c.bf16 %v223_v30, %v222_v29  ;;  %v713_v34 = vpack.c.bf16 %v225_v33, %v224_v32  ;;  %v346_v35 = vld [vmem:[#allocation5] sm:$0xff]  ;;  %v347_v36 = vld [vmem:[#allocation5 + $0x8] sm:$0xff]  ;;  %v348_v37 = vld [vmem:[#allocation5 + $0x10] sm:$0xff] }
  0x30   :  { %692 = vmatpush3.bf16.msra.mxu1 %v689_v11  ;;  %v717_v38 = vpack.c.bf16 %v347_v36, %v346_v35  ;;  %v349_v39 = vld [vmem:[#allocation5 + $0x18] sm:$0xff]  ;;  %v350_v41 = vld [vmem:[#allocation5 + $0x20] sm:$0xff]  ;;  %v351_v42 = vld [vmem:[#allocation5 + $0x28] sm:$0xff] }
  0x31   :  { %585 = vmatmul.mubr.msk.f32.gmra.mrb[2].mxu0 %vm72_vm0, %v58_v14  ;;  %694 = vmatprep.subr.bf16.mxu1 %v693_v15  ;;  %v721_v40 = vpack.c.bf16 %v349_v39, %v348_v37  ;;  %v725_v43 = vpack.c.bf16 %v351_v42, %v350_v41  ;;  %v352_v44 = vld [vmem:[#allocation5 + $0x30] sm:$0xff]  ;;  %v353_v45 = vld [vmem:[#allocation5 + $0x38] sm:$0xff]  ;;  %v508_v47 = vld [vmem:[%s1013_s2] ss:$0 sm:$0xff] }
  0x32   :  { %587 = vmatprep.mubr.msk.f32.mxu0 %vm72_vm0, %v59_v16  ;;  %718 = vmatprep.subr.bf16.mxu0 %v717_v38  ;;  %v729_v46 = vpack.c.bf16 %v353_v45, %v352_v44  ;;  %v354_v8 = vld [vmem:[#allocation5 + $0x40] sm:$0xff]  ;;  %v355_v9 = vld [vmem:[#allocation5 + $0x48] sm:$0xff]  ;;  %v356_v11 = vld [vmem:[#allocation5 + $0x50] sm:$0xff] }
  0x33   :  { %720 = vmatpush3.bf16.msra.mxu0 %v717_v38  ;;  %v733_v10 = vpack.c.bf16 %v355_v9, %v354_v8  ;;  %v357_v12 = vld [vmem:[#allocation5 + $0x58] sm:$0xff]  ;;  %v358_v14 = vld [vmem:[#allocation5 + $0x60] sm:$0xff]  ;;  %v360_v17 = vld [vmem:[#allocation5 + $0x70] sm:$0xff] }
  0x34   :  { %696 = vmatpush3.bf16.msra.mxu1 %v693_v15  ;;  %722 = vmatprep.subr.bf16.mxu0 %v721_v40  ;;  %v737_v13 = vpack.c.bf16 %v357_v12, %v356_v11  ;;  %v359_v15 = vld [vmem:[#allocation5 + $0x68] sm:$0xff]  ;;  %v361_v18 = vld [vmem:[#allocation5 + $0x78] sm:$0xff]  ;;  %v518_v45 = vld [vmem:[%s1017_s6] ss:$0 sm:$0xff]  ;;  %s878_s6 = smov [#allocation7]  }
  0x35   :  { %588 = vmatmul.mubr.msk.f32.gmra.mrb[4].mxu0 %vm72_vm0, %v60_v19  ;;  %698 = vmatprep.subr.bf16.mxu1 %v697_v20  ;;  %v741_v16 = vpack.c.bf16 %v359_v15, %v358_v14  ;;  %v745_v19 = vpack.c.bf16 %v361_v18, %v360_v17  ;;  %s495_s25 = sshll.u32 %s878_s6, 4  ;;  %s496_s25 = int_to_ptr.vmem [resolvable:$true] %s495_s25 }
  0x36   :  { %590 = vmatprep.mubr.msk.f32.mxu0 %vm72_vm0, %v61_v21  ;;  %s846_s26 = scalar_lea.vmem %s496_s25, 1024  ;;  %p851_p3 = scmp.lt.s32.totalorder %s496_s25, %s496_s25 }
  0x37   :  { %724 = vmatpush3.bf16.msra.mxu0 %v721_v40  ;;  %p847_p2 = scmp.ne.s32.totalorder %s496_s25, %s846_s26  ;;  %p852_p4 = scmp.lt.s32.totalorder %s846_s26, %s846_s26 }
  0x38   :  { %700 = vmatpush3.bf16.msra.mxu1 %v697_v20  ;;  %726 = vmatprep.subr.bf16.mxu0 %v725_v43  ;;  %v517_v20 = vld [vmem:[%s1015_s4] ss:$0 sm:$0xff] }
  0x39   :  { %591 = vmatmul.mubr.msk.f32.gmra.mrb[6].mxu0 %vm72_vm0, %v62_v22  ;;  %702 = vmatprep.subr.bf16.mxu1 %v701_v25  ;;  %p853_p5 = por %p852_p4, %p851_p3 }
  0x3b   :  { %728 = vmatpush3.bf16.msra.mxu0 %v725_v43  ;;  %p854_p6 = pnand %p853_p5, %p847_p2 }
  0x3c   :  { %704 = vmatpush3.bf16.msra.mxu1 %v701_v25  ;;  %730 = vmatprep.subr.bf16.mxu0 %v729_v46 }
  0x3d   :  { %706 = vmatprep.subr.bf16.mxu1 %v705_v28 }
  0x3f   :  { %732 = vmatpush3.bf16.msra.mxu0 %v729_v46 }
  0x40   :  { %708 = vmatpush3.bf16.msra.mxu1 %v705_v28  ;;  %734 = vmatprep.subr.bf16.mxu0 %v733_v10 }
  0x41   :  { %710 = vmatprep.subr.bf16.mxu1 %v709_v31 }
  0x43   :  { %736 = vmatpush3.bf16.msra.mxu0 %v733_v10 }
  0x44   :  { %712 = vmatpush3.bf16.msra.mxu1 %v709_v31  ;;  %738 = vmatprep.subr.bf16.mxu0 %v737_v13 }
  0x45   :  { %714 = vmatprep.subr.bf16.mxu1 %v713_v34 }
  0x47   :  { %740 = vmatpush3.bf16.msra.mxu0 %v737_v13 }
  0x48   :  { %716 = vmatpush3.bf16.msra.mxu1 %v713_v34  ;;  %742 = vmatprep.subr.bf16.mxu0 %v741_v16 }
  0x4b   :  { %744 = vmatpush3.bf16.msra.mxu0 %v741_v16 }
  0x4c   :  { %746 = vmatprep.subr.bf16.mxu0 %v745_v19 }
  0x4f   :  { %748 = vmatpush3.bf16.msra.mxu0 %v745_v19 }
 0x100   :  { %v583_v48 = vpop.f32.mrb[0].mxu0 }
 0x101   :  { %v169_v49 = vadd.f32 %v583_v48, %v508_v47  ;;  %v163_v50 = vpop.f32.mrb[1].mxu0 }
 0x102   :  { %v164_v51 = vadd.f32 %v508_v47, %v163_v50 }
 0x104   :  { %754 = vtanh.f32 %v164_v51  ;;  %v586_v52 = vpop.f32.mrb[2].mxu0 }
 0x105   :  { %756 = vtanh.f32 %v169_v49  ;;  %v179_v53 = vadd.f32 %v586_v52, %v508_v47  ;;  %v173_v54 = vpop.f32.mrb[3].mxu0 }
 0x106   :  { %v174_v55 = vadd.f32 %v508_v47, %v173_v54 }
 0x108   :  { %758 = vtanh.f32 %v174_v55  ;;  %v589_v56 = vpop.f32.mrb[4].mxu0 }
 0x109   :  { %760 = vtanh.f32 %v179_v53  ;;  %v189_v57 = vadd.f32 %v589_v56, %v508_v47  ;;  %v183_v58 = vpop.f32.mrb[5].mxu0 }
 0x10a   :  { %v184_v59 = vadd.f32 %v508_v47, %v183_v58 }
 0x10c   :  { %762 = vtanh.f32 %v184_v59  ;;  %v592_v60 = vpop.f32.mrb[6].mxu0 }
 0x10d   :  { %764 = vtanh.f32 %v189_v57  ;;  %v199_v61 = vadd.f32 %v592_v60, %v508_v47  ;;  %v193_v62 = vpop.f32.mrb[7].mxu0 }
 0x10e   :  { %v755_v63 = vpop.eup %754  ;;  %v194_v0 = vadd.f32 %v508_v47, %v193_v62 }
 0x10f   :  { %v757_v1 = vpop.eup %756  ;;  %625 = vmatprep.mubr.f32.mxu1 %v755_v63 }
 0x110   :  { %766 = vtanh.f32 %v194_v0  ;;  %626 = vmatmul.mubr.f32.vlgmr.msra.gmra.mrb[0].mxu1 %v757_v1 }
 0x111   :  { %768 = vtanh.f32 %v199_v61 }
 0x112   :  { %v759_v2 = vpop.eup %758 }
 0x113   :  { %v761_v3 = vpop.eup %760  ;;  %628 = vmatprep.mubr.f32.mxu1 %v759_v2 }
 0x114   :  { %629 = vmatmul.mubr.f32.gmra.mrb[2].mxu1 %v761_v3 }
 0x116   :  { %v763_v4 = vpop.eup %762 }
 0x117   :  { %v765_v5 = vpop.eup %764  ;;  %631 = vmatprep.mubr.f32.mxu1 %v763_v4 }
 0x118   :  { %632 = vmatmul.mubr.f32.gmra.mrb[4].mxu1 %v765_v5 }
 0x11a   :  { %v767_v6 = vpop.eup %766 }
 0x11b   :  { %v769_v7 = vpop.eup %768  ;;  %634 = vmatprep.mubr.f32.mxu1 %v767_v6 }
 0x11c   :  { %635 = vmatmul.mubr.f32.gmra.mrb[6].mxu1 %v769_v7 }
 0x1e3   :  { %v627_v21 = vpop.f32.mrb[0].mxu1 }
 0x1e4   :  { %v305_v22 = vadd.f32 %v627_v21, %v517_v20  ;;  %v299_v23 = vpop.f32.mrb[1].mxu1 }
 0x1e5   :  { %v300_v24 = vadd.f32 %v517_v20, %v299_v23 }
 0x1e7   :  { %770 = vtanh.f32 %v300_v24  ;;  %v630_v25 = vpop.f32.mrb[2].mxu1 }
 0x1e8   :  { %772 = vtanh.f32 %v305_v22  ;;  %v315_v26 = vadd.f32 %v630_v25, %v517_v20  ;;  %v309_v27 = vpop.f32.mrb[3].mxu1 }
 0x1e9   :  { %v310_v28 = vadd.f32 %v517_v20, %v309_v27 }
 0x1eb   :  { %774 = vtanh.f32 %v310_v28  ;;  %v633_v29 = vpop.f32.mrb[4].mxu1 }
 0x1ec   :  { %776 = vtanh.f32 %v315_v26  ;;  %v325_v30 = vadd.f32 %v633_v29, %v517_v20  ;;  %v319_v31 = vpop.f32.mrb[5].mxu1 }
 0x1ed   :  { %v320_v32 = vadd.f32 %v517_v20, %v319_v31 }
 0x1ef   :  { %778 = vtanh.f32 %v320_v32  ;;  %v636_v33 = vpop.f32.mrb[6].mxu1 }
 0x1f0   :  { %780 = vtanh.f32 %v325_v30  ;;  %v335_v34 = vadd.f32 %v636_v33, %v517_v20  ;;  %v329_v35 = vpop.f32.mrb[7].mxu1 }
 0x1f1   :  { %v771_v36 = vpop.eup %770  ;;  %v330_v37 = vadd.f32 %v517_v20, %v329_v35 }
 0x1f2   :  { %v773_v38 = vpop.eup %772  ;;  %669 = vmatprep.mubr.f32.mxu0 %v771_v36 }
 0x1f3   :  { %782 = vtanh.f32 %v330_v37  ;;  %670 = vmatmul.mubr.f32.vlgmr.msra.gmra.mrb[8].mxu0 %v773_v38 }
 0x1f4   :  { %784 = vtanh.f32 %v335_v34 }
 0x1f5   :  { %v775_v39 = vpop.eup %774 }
 0x1f6   :  { %v777_v40 = vpop.eup %776  ;;  %672 = vmatprep.mubr.f32.mxu0 %v775_v39 }
 0x1f7   :  { %673 = vmatmul.mubr.f32.gmra.mrb[10].mxu0 %v777_v40 }
 0x1f9   :  { %v779_v41 = vpop.eup %778 }
 0x1fa   :  { %v781_v42 = vpop.eup %780  ;;  %675 = vmatprep.mubr.f32.mxu0 %v779_v41 }
 0x1fb   :  { %676 = vmatmul.mubr.f32.gmra.mrb[12].mxu0 %v781_v42 }
 0x1fd   :  { %v783_v43 = vpop.eup %782 }
 0x1fe   :  { %v785_v44 = vpop.eup %784  ;;  %678 = vmatprep.mubr.f32.mxu0 %v783_v43 }
 0x1ff   :  { %679 = vmatmul.mubr.f32.gmra.mrb[14].mxu0 %v785_v44 }
 0x2c6   :  { %v671_v46 = vpop.f32.mrb[8].mxu0 }
 0x2c7   :  { %v441_v47 = vadd.f32 %v671_v46, %v518_v45  ;;  %v435_v48 = vpop.f32.mrb[9].mxu0 }
 0x2c8   :  { %v436_v49 = vadd.f32 %v518_v45, %v435_v48 }
 0x2c9   :  { %786 = vtanh.f32 %v441_v47 }
 0x2ca   :  { %788 = vtanh.f32 %v436_v49  ;;  %v674_v50 = vpop.f32.mrb[10].mxu0 }
 0x2cb   :  { %v451_v51 = vadd.f32 %v674_v50, %v518_v45  ;;  %v445_v52 = vpop.f32.mrb[11].mxu0 }
 0x2cc   :  { %v446_v53 = vadd.f32 %v518_v45, %v445_v52 }
 0x2cd   :  { %790 = vtanh.f32 %v451_v51 }
 0x2ce   :  { %792 = vtanh.f32 %v446_v53  ;;  %v677_v54 = vpop.f32.mrb[12].mxu0 }
 0x2cf   :  { %v461_v55 = vadd.f32 %v677_v54, %v518_v45  ;;  %v455_v56 = vpop.f32.mrb[13].mxu0 }
 0x2d0   :  { %v456_v57 = vadd.f32 %v518_v45, %v455_v56 }
 0x2d1   :  { %794 = vtanh.f32 %v461_v55 }
 0x2d2   :  { %796 = vtanh.f32 %v456_v57  ;;  %v680_v58 = vpop.f32.mrb[14].mxu0 }
 0x2d3   :  { %v787_v59 = vpop.eup %786  ;;  %v471_v60 = vadd.f32 %v680_v58, %v518_v45  ;;  %v465_v61 = vpop.f32.mrb[15].mxu0 }
 0x2d4   :  { %v789_v62 = vpop.eup %788  ;;  %483 = vst [vmem:[#allocation7 + $0x8] sm:$0xff] %v787_v59  ;;  %v466_v63 = vadd.f32 %v518_v45, %v465_v61 }
 0x2d5   :  { %482 = vst [vmem:[#allocation7] sm:$0xff] %v789_v62  ;;  %798 = vtanh.f32 %v471_v60 }
 0x2d6   :  { %800 = vtanh.f32 %v466_v63 }
 0x2d7   :  { %v791_v0 = vpop.eup %790 }
 0x2d8   :  { %v793_v1 = vpop.eup %792  ;;  %485 = vst [vmem:[#allocation7 + $0x18] sm:$0xff] %v791_v0 }
 0x2d9   :  { %484 = vst [vmem:[#allocation7 + $0x10] sm:$0xff] %v793_v1 }
 0x2db   :  { %v795_v2 = vpop.eup %794 }
 0x2dc   :  { %v797_v3 = vpop.eup %796  ;;  %487 = vst [vmem:[#allocation7 + $0x28] sm:$0xff] %v795_v2 }
 0x2dd   :  { %486 = vst [vmem:[#allocation7 + $0x20] sm:$0xff] %v797_v3 }
 0x2df   :  { %v799_v4 = vpop.eup %798 }
 0x2e0   :  { %v801_v5 = vpop.eup %800  ;;  %489 = vst [vmem:[#allocation7 + $0x38] sm:$0xff] %v799_v4 }
 0x2e1   :  { %488 = vst [vmem:[#allocation7 + $0x30] sm:$0xff] %v801_v5 }
 0x2e2   :  { %857 = shalt.err (!%p854_p6)
}
 0x2e3   :  { %s858_s29 = scalar_lea.hbm %s1018_s7, 1024 }
 0x2e4   :  { %p859_p7 = scmp.ne.s32.totalorder %s1018_s7, %s858_s29  ;;  %p862_p8 = scmp.lt.u32.totalorder %s858_s29, %s1018_s7 }
 0x2e6   :  { %p864_p9 = pnand %p862_p8, %p859_p7 }
 0x2e8   :  { %867 = shalt.err (!%p864_p9)
}
 0x2e9   :  { %501 = dma.vmem_to_hbm [thread:$0]  %s496_s25, 1024, %s1018_s7, [#allocation4], %s875_s11, %s875_s11, %s876_s12  }
 0x2ea   :  { %872 = dma.done.wait [#allocation4], 1024  }
 0x2eb   :  { %873 = vsyncadd [#allocation4], 4294966272 }
 0x2ec   :  { %505 = vsyncpa [#allocation3], 1 }
 0x2ed   :  { %506 = vsyncpa [#allocation6], 1 }
 0x2ee   :  { %507 = vsyncpa [#allocation4], 1 }

</bundles_post_ra>
